<compile_context>
chip_gen: v6e
topology: v6e:2x2x1
jax: 0.10.0
libtpu: 0.0.40
codegen_flags: <defaults>
</compile_context>

<pallas_src>
import numpy as np
import jax
import jax.numpy as jnp
from jax import lax
from jax.experimental import pallas as pl
from jax.experimental.pallas import tpu as pltpu

# ---- problem sizes (small, consistent with the module) ----
S = 8          # sequence length
B = 2          # batch
D = 32         # d_model (input_size)
H = 4          # num_heads
HD = D // H    # head dim
DFF = 64       # dim_feedforward
O = 16         # output_size
EPS = 1e-5     # layer_norm_eps (PyTorch default)

SB = S * B     # flattened token count; row r = s*B + b  =>  batch = r % B
P = H * SB     # packed (head, token) rows

# ---- single parameter slab layout (f32, 128 lanes wide, 8-aligned rows) ----
LANES = 128
R_WQ = 0                      # (D, D)   q proj (scale folded in)
R_WK = 32                     # (D, D)
R_WV = 64                     # (D, D)
R_WAO = 96                    # (D, D)   attn out proj
R_W1 = 128                    # (D, DFF) linear1
R_W2 = 160                    # (DFF, D) linear2
R_WOUT = 224                  # (D, O)   final Linear
R_HMASK = 256                 # (P, D)   head lane mask (0/1)
R_BMASK = 320                 # (P, SB)  additive batch mask (0 / -1e30)
R_VEC = 384                   # vectors, one per 8-row block:
# 0:bq(scaled) 1:bk 2:bv 3:bao 4:g1 5:be1 6:bf1 7:bf2 8:g2 9:be2 10:bout
SLAB_ROWS = R_VEC + 11 * 8    # 472


def _layernorm(x, gamma, beta):
    mu = jnp.mean(x, axis=-1, keepdims=True)
    var = jnp.mean((x - mu) ** 2, axis=-1, keepdims=True)   # biased, like PyTorch
    return (x - mu) * lax.rsqrt(var + EPS) * gamma + beta


def encoder_kernel(x_ref, slab_ref, o_ref):
    f32 = jnp.float32
    x = x_ref[...]                                           # (SB, D)

    # ---- carve the single parameter slab (all slices 8/128-aligned, lane 0) ----
    wq = slab_ref[pl.ds(R_WQ, D), pl.ds(0, D)]
    wk = slab_ref[pl.ds(R_WK, D), pl.ds(0, D)]
    wv = slab_ref[pl.ds(R_WV, D), pl.ds(0, D)]
    wao = slab_ref[pl.ds(R_WAO, D), pl.ds(0, D)]
    w1 = slab_ref[pl.ds(R_W1, D), pl.ds(0, DFF)]
    w2 = slab_ref[pl.ds(R_W2, DFF), pl.ds(0, D)]
    wout = slab_ref[pl.ds(R_WOUT, D), pl.ds(0, O)]
    hmask = slab_ref[pl.ds(R_HMASK, P), pl.ds(0, D)]         # (P, D) 0/1
    bmask = slab_ref[pl.ds(R_BMASK, P), pl.ds(0, SB)]        # (P, SB) additive

    def vec(i, width):
        return slab_ref[pl.ds(R_VEC + 8 * i, 1), pl.ds(0, width)]

    bq, bk, bv, bao = vec(0, D), vec(1, D), vec(2, D), vec(3, D)
    g1, be1 = vec(4, D), vec(5, D)
    bf1, bf2 = vec(6, DFF), vec(7, D)
    g2, be2 = vec(8, D), vec(9, D)
    bout = vec(10, O)

    # ---- q/k/v projections (scale already folded into wq/bq) ----
    q = jnp.dot(x, wq, preferred_element_type=f32) + bq      # (SB, D)
    k = jnp.dot(x, wk, preferred_element_type=f32) + bk
    v = jnp.dot(x, wv, preferred_element_type=f32) + bv

    # ---- all-head attention without any lane-offset relayout ----
    # Replicate q along sublanes (one copy per head) and zero non-head lanes;
    # contracting over full D then only the head's lanes contribute.
    qm = jnp.concatenate([q] * H, axis=0) * hmask            # (P, D)
    scores = lax.dot_general(qm, k, (((1,), (1,)), ((), ())),
                             preferred_element_type=f32) + bmask          # (P, SB)
    m = jnp.max(scores, axis=-1, keepdims=True)
    e = jnp.exp(scores - m)
    denom = jnp.sum(e, axis=-1, keepdims=True)
    probs = e * pl.reciprocal(denom, approx=False)           # exact; EUP-friendly
    pv = jnp.dot(probs, v, preferred_element_type=f32) * hmask            # (P, D)

    # Recombine heads: sublane-aligned slices (offsets 0/16/32/48) + adds.
    attn = pv[0:SB, :]
    for h in range(1, H):
        attn = attn + pv[h * SB:(h + 1) * SB, :]
    attn = jnp.dot(attn, wao, preferred_element_type=f32) + bao           # (SB, D)

    h1 = _layernorm(x + attn, g1, be1)                       # post-norm 1

    # ---- feed forward (relu) ----
    ff = jnp.maximum(jnp.dot(h1, w1, preferred_element_type=f32) + bf1, 0.0)
    ff = jnp.dot(ff, w2, preferred_element_type=f32) + bf2

    h2 = _layernorm(h1 + ff, g2, be2)                        # post-norm 2

    # ---- output head + sigmoid ----
    logits = jnp.dot(h2, wout, preferred_element_type=f32) + bout
    o_ref[...] = jax.nn.sigmoid(logits).astype(o_ref.dtype)


def build_slab(p):
    """Pack all parameters + attention constants into one contiguous f32 slab."""
    scale = 1.0 / np.sqrt(HD)
    slab = np.zeros((SLAB_ROWS, LANES), np.float32)

    def put(r, a):
        a = np.asarray(a, np.float32)
        slab[r:r + a.shape[0], :a.shape[1]] = a

    put(R_WQ, np.asarray(p["w_q_t"]) * scale)      # fold 1/sqrt(HD) into Q proj
    put(R_WK, p["w_k_t"])
    put(R_WV, p["w_v_t"])
    put(R_WAO, p["w_ao_t"])
    put(R_W1, p["w1_t"])
    put(R_W2, p["w2_t"])
    put(R_WOUT, p["w_out_t"])

    hm = np.zeros((P, D), np.float32)              # head lane mask
    for h in range(H):
        hm[h * SB:(h + 1) * SB, h * HD:(h + 1) * HD] = 1.0
    put(R_HMASK, hm)

    tok = np.arange(SB)                            # additive same-batch mask
    same = (tok[:, None] % B) == (tok[None, :] % B)
    add = np.where(same, 0.0, -1e30).astype(np.float32)
    put(R_BMASK, np.tile(add, (H, 1)))

    vecs = [np.asarray(p["b_q"]) * scale, p["b_k"], p["b_v"], p["b_ao"],
            p["g1"], p["be1"], p["bf1"], p["bf2"], p["g2"], p["be2"], p["b_out"]]
    for i, vrow in enumerate(vecs):
        put(R_VEC + 8 * i, np.asarray(vrow, np.float32).reshape(1, -1))
    return jnp.asarray(slab)


def model_forward(x_sbd, slab):
    """x_sbd: (S, B, D) like PyTorch (batch_first=False). Returns (S, B, O)."""
    x_flat = x_sbd.reshape(SB, D).astype(jnp.float32)   # zero-copy leading-dim merge
    out_flat = pl.pallas_call(
        encoder_kernel,
        out_shape=jax.ShapeDtypeStruct((SB, O), jnp.float32),
        in_specs=[pl.BlockSpec(memory_space=pltpu.MemorySpace.VMEM),
                  pl.BlockSpec(memory_space=pltpu.MemorySpace.VMEM)],
        out_specs=pl.BlockSpec(memory_space=pltpu.MemorySpace.VMEM),
    )(x_flat, slab)
    return out_flat.reshape(S, B, O)                     # zero-copy split


def reference_forward(x_sbd, p):
    """Pure-JAX reference matching PyTorch semantics (for validation)."""
    x = jnp.transpose(x_sbd, (1, 0, 2)).astype(jnp.float32)   # (B, S, D)
    q = x @ p["w_q_t"] + p["b_q"]
    k = x @ p["w_k_t"] + p["b_k"]
    v = x @ p["w_v_t"] + p["b_v"]

    def heads(t):
        return t.reshape(B, S, H, HD).transpose(0, 2, 1, 3)   # (B, H, S, HD)

    qh, kh, vh = heads(q), heads(k), heads(v)
    scores = jnp.einsum("bhqd,bhkd->bhqk", qh, kh) / (HD ** 0.5)
    attn = jnp.einsum("bhqk,bhkd->bhqd", jax.nn.softmax(scores, -1), vh)
    attn = attn.transpose(0, 2, 1, 3).reshape(B, S, D) @ p["w_ao_t"] + p["b_ao"]
    h1 = _layernorm(x + attn, p["g1"], p["be1"])
    ff = jnp.maximum(h1 @ p["w1_t"] + p["bf1"], 0.0) @ p["w2_t"] + p["bf2"]
    h2 = _layernorm(h1 + ff, p["g2"], p["be2"])
    out = jax.nn.sigmoid(h2 @ p["w_out_t"] + p["b_out"])
    return jnp.transpose(out, (1, 0, 2))


def init_params(key):
    ks = jax.random.split(key, 14)
    sd = 0.1

    def rnd(k, shape):
        return jax.random.normal(k, shape, jnp.float32) * sd

    return {
        "w_q_t": rnd(ks[0], (D, D)),   "b_q": rnd(ks[1], (1, D)),
        "w_k_t": rnd(ks[2], (D, D)),   "b_k": rnd(ks[3], (1, D)),
        "w_v_t": rnd(ks[4], (D, D)),   "b_v": rnd(ks[5], (1, D)),
        "w_ao_t": rnd(ks[6], (D, D)),  "b_ao": rnd(ks[7], (1, D)),
        "g1": jnp.ones((1, D), jnp.float32), "be1": jnp.zeros((1, D), jnp.float32),
        "w1_t": rnd(ks[8], (D, DFF)),  "bf1": rnd(ks[9], (1, DFF)),
        "w2_t": rnd(ks[10], (DFF, D)), "bf2": rnd(ks[11], (1, D)),
        "g2": jnp.ones((1, D), jnp.float32), "be2": jnp.zeros((1, D), jnp.float32),
        "w_out_t": rnd(ks[12], (D, O)), "b_out": rnd(ks[13], (1, O)),
    }


if __name__ == "__main__":
    key = jax.random.PRNGKey(0)
    kx, kp = jax.random.split(key)
    x = jax.random.normal(kx, (S, B, D), jnp.float32)   # (seq, batch, d_model)
    params = init_params(kp)
    slab = build_slab(params)

    fwd = jax.jit(model_forward)
    out = jax.block_until_ready(fwd(x, slab))

    ref = reference_forward(x, params)
    assert out.shape == (S, B, O)
    assert jnp.allclose(out, ref, atol=1e-4, rtol=1e-4), "mismatch vs reference"

    print("KERNEL_OK")
</pallas_src>

<mosaic_0001>
module attributes {stable_mosaic.version = 11 : i64} {
  func.func @encoder_kernel(%arg0: memref<16x32xf32, #tpu.memory_space<vmem>>, %arg1: memref<472x128xf32, #tpu.memory_space<vmem>>, %arg2: memref<16x16xf32, #tpu.memory_space<vmem>>) attributes {dimension_semantics = [], scalar_prefetch = 0 : i64, scratch_operands = 0 : i64, tpu.core_type = #tpu.core_type<tc>} {
    %c0 = arith.constant 0 : index
    %c0_0 = arith.constant 0 : index
    %0 = vector.load %arg0[%c0, %c0_0] : memref<16x32xf32, #tpu.memory_space<vmem>>, vector<16x32xf32>
    %c0_1 = arith.constant 0 : index
    %c0_2 = arith.constant 0 : index
    %1 = vector.load %arg1[%c0_1, %c0_2] : memref<472x128xf32, #tpu.memory_space<vmem>>, vector<32x32xf32>
    %c32 = arith.constant 32 : index
    %c0_3 = arith.constant 0 : index
    %2 = vector.load %arg1[%c32, %c0_3] : memref<472x128xf32, #tpu.memory_space<vmem>>, vector<32x32xf32>
    %c64 = arith.constant 64 : index
    %c0_4 = arith.constant 0 : index
    %3 = vector.load %arg1[%c64, %c0_4] : memref<472x128xf32, #tpu.memory_space<vmem>>, vector<32x32xf32>
    %c96 = arith.constant 96 : index
    %c0_5 = arith.constant 0 : index
    %4 = vector.load %arg1[%c96, %c0_5] : memref<472x128xf32, #tpu.memory_space<vmem>>, vector<32x32xf32>
    %c128 = arith.constant 128 : index
    %c0_6 = arith.constant 0 : index
    %5 = vector.load %arg1[%c128, %c0_6] : memref<472x128xf32, #tpu.memory_space<vmem>>, vector<32x64xf32>
    %c160 = arith.constant 160 : index
    %c0_7 = arith.constant 0 : index
    %6 = vector.load %arg1[%c160, %c0_7] : memref<472x128xf32, #tpu.memory_space<vmem>>, vector<64x32xf32>
    %c224 = arith.constant 224 : index
    %c0_8 = arith.constant 0 : index
    %7 = vector.load %arg1[%c224, %c0_8] : memref<472x128xf32, #tpu.memory_space<vmem>>, vector<32x16xf32>
    %c256 = arith.constant 256 : index
    %c0_9 = arith.constant 0 : index
    %8 = vector.load %arg1[%c256, %c0_9] : memref<472x128xf32, #tpu.memory_space<vmem>>, vector<64x32xf32>
    %c320 = arith.constant 320 : index
    %c0_10 = arith.constant 0 : index
    %9 = vector.load %arg1[%c320, %c0_10] : memref<472x128xf32, #tpu.memory_space<vmem>>, vector<64x16xf32>
    %c384 = arith.constant 384 : index
    %c0_11 = arith.constant 0 : index
    %10 = vector.load %arg1[%c384, %c0_11] : memref<472x128xf32, #tpu.memory_space<vmem>>, vector<1x32xf32>
    %c392 = arith.constant 392 : index
    %c0_12 = arith.constant 0 : index
    %11 = vector.load %arg1[%c392, %c0_12] : memref<472x128xf32, #tpu.memory_space<vmem>>, vector<1x32xf32>
    %c400 = arith.constant 400 : index
    %c0_13 = arith.constant 0 : index
    %12 = vector.load %arg1[%c400, %c0_13] : memref<472x128xf32, #tpu.memory_space<vmem>>, vector<1x32xf32>
    %c408 = arith.constant 408 : index
    %c0_14 = arith.constant 0 : index
    %13 = vector.load %arg1[%c408, %c0_14] : memref<472x128xf32, #tpu.memory_space<vmem>>, vector<1x32xf32>
    %c416 = arith.constant 416 : index
    %c0_15 = arith.constant 0 : index
    %14 = vector.load %arg1[%c416, %c0_15] : memref<472x128xf32, #tpu.memory_space<vmem>>, vector<1x32xf32>
    %c424 = arith.constant 424 : index
    %c0_16 = arith.constant 0 : index
    %15 = vector.load %arg1[%c424, %c0_16] : memref<472x128xf32, #tpu.memory_space<vmem>>, vector<1x32xf32>
    %c432 = arith.constant 432 : index
    %c0_17 = arith.constant 0 : index
    %16 = vector.load %arg1[%c432, %c0_17] : memref<472x128xf32, #tpu.memory_space<vmem>>, vector<1x64xf32>
    %c440 = arith.constant 440 : index
    %c0_18 = arith.constant 0 : index
    %17 = vector.load %arg1[%c440, %c0_18] : memref<472x128xf32, #tpu.memory_space<vmem>>, vector<1x32xf32>
    %c448 = arith.constant 448 : index
    %c0_19 = arith.constant 0 : index
    %18 = vector.load %arg1[%c448, %c0_19] : memref<472x128xf32, #tpu.memory_space<vmem>>, vector<1x32xf32>
    %c456 = arith.constant 456 : index
    %c0_20 = arith.constant 0 : index
    %19 = vector.load %arg1[%c456, %c0_20] : memref<472x128xf32, #tpu.memory_space<vmem>>, vector<1x32xf32>
    %c464 = arith.constant 464 : index
    %c0_21 = arith.constant 0 : index
    %20 = vector.load %arg1[%c464, %c0_21] : memref<472x128xf32, #tpu.memory_space<vmem>>, vector<1x16xf32>
    %cst = arith.constant dense<0.000000e+00> : vector<16x32xf32>
    %21 = tpu.matmul %0, %1, %cst {dimension_numbers = #tpu.dot_dimension_numbers<[1], [0], [0], [1], [0, 0, 1, 1], [], []>} : vector<16x32xf32>, vector<32x32xf32>, vector<16x32xf32> -> vector<16x32xf32>
    %22 = vector.broadcast %10 : vector<1x32xf32> to vector<16x32xf32>
    %23 = arith.addf %21, %22 : vector<16x32xf32>
    %cst_22 = arith.constant dense<0.000000e+00> : vector<16x32xf32>
    %24 = tpu.matmul %0, %2, %cst_22 {dimension_numbers = #tpu.dot_dimension_numbers<[1], [0], [0], [1], [0, 0, 1, 1], [], []>} : vector<16x32xf32>, vector<32x32xf32>, vector<16x32xf32> -> vector<16x32xf32>
    %25 = vector.broadcast %11 : vector<1x32xf32> to vector<16x32xf32>
    %26 = arith.addf %24, %25 : vector<16x32xf32>
    %cst_23 = arith.constant dense<0.000000e+00> : vector<16x32xf32>
    %27 = tpu.matmul %0, %3, %cst_23 {dimension_numbers = #tpu.dot_dimension_numbers<[1], [0], [0], [1], [0, 0, 1, 1], [], []>} : vector<16x32xf32>, vector<32x32xf32>, vector<16x32xf32> -> vector<16x32xf32>
    %28 = vector.broadcast %12 : vector<1x32xf32> to vector<16x32xf32>
    %29 = arith.addf %27, %28 : vector<16x32xf32>
    %30 = tpu.concatenate %23, %23, %23, %23 in 0 : vector<16x32xf32>, vector<16x32xf32>, vector<16x32xf32>, vector<16x32xf32> -> vector<64x32xf32>
    %31 = arith.mulf %30, %8 : vector<64x32xf32>
    %cst_24 = arith.constant dense<0.000000e+00> : vector<64x16xf32>
    %32 = tpu.matmul %31, %26, %cst_24 {dimension_numbers = #tpu.dot_dimension_numbers<[1], [1], [0], [0], [0, 0, 1, 0], [], []>} : vector<64x32xf32>, vector<16x32xf32>, vector<64x16xf32> -> vector<64x16xf32>
    %33 = arith.addf %32, %9 : vector<64x16xf32>
    %cst_25 = arith.constant dense<0xFF800000> : vector<64xf32>
    %34 = vector.multi_reduction <maximumf>, %33, %cst_25 [1] : vector<64x16xf32> to vector<64xf32>
    %35 = vector.shape_cast %34 : vector<64xf32> to vector<64x1xf32>
    %36 = vector.broadcast %35 : vector<64x1xf32> to vector<64x16xf32>
    %37 = arith.subf %33, %36 : vector<64x16xf32>
    %38 = math.exp %37 : vector<64x16xf32>
    %cst_26 = arith.constant dense<0.000000e+00> : vector<64xf32>
    %39 = vector.multi_reduction <add>, %38, %cst_26 [1] : vector<64x16xf32> to vector<64xf32>
    %40 = vector.shape_cast %39 : vector<64xf32> to vector<64x1xf32>
    %41 = tpu.reciprocal %40 : vector<64x1xf32> -> vector<64x1xf32>
    %42 = vector.broadcast %41 : vector<64x1xf32> to vector<64x16xf32>
    %43 = arith.mulf %38, %42 : vector<64x16xf32>
    %cst_27 = arith.constant dense<0.000000e+00> : vector<64x32xf32>
    %44 = tpu.matmul %43, %29, %cst_27 {dimension_numbers = #tpu.dot_dimension_numbers<[1], [0], [0], [1], [0, 0, 1, 1], [], []>} : vector<64x16xf32>, vector<16x32xf32>, vector<64x32xf32> -> vector<64x32xf32>
    %45 = arith.mulf %44, %8 : vector<64x32xf32>
    %46 = vector.extract_strided_slice %45 {offsets = [0, 0], sizes = [16, 32], strides = [1, 1]} : vector<64x32xf32> to vector<16x32xf32>
    %47 = vector.extract_strided_slice %45 {offsets = [16, 0], sizes = [16, 32], strides = [1, 1]} : vector<64x32xf32> to vector<16x32xf32>
    %48 = arith.addf %46, %47 : vector<16x32xf32>
    %49 = vector.extract_strided_slice %45 {offsets = [32, 0], sizes = [16, 32], strides = [1, 1]} : vector<64x32xf32> to vector<16x32xf32>
    %50 = arith.addf %48, %49 : vector<16x32xf32>
    %51 = vector.extract_strided_slice %45 {offsets = [48, 0], sizes = [16, 32], strides = [1, 1]} : vector<64x32xf32> to vector<16x32xf32>
    %52 = arith.addf %50, %51 : vector<16x32xf32>
    %cst_28 = arith.constant dense<0.000000e+00> : vector<16x32xf32>
    %53 = tpu.matmul %52, %4, %cst_28 {dimension_numbers = #tpu.dot_dimension_numbers<[1], [0], [0], [1], [0, 0, 1, 1], [], []>} : vector<16x32xf32>, vector<32x32xf32>, vector<16x32xf32> -> vector<16x32xf32>
    %54 = vector.broadcast %13 : vector<1x32xf32> to vector<16x32xf32>
    %55 = arith.addf %53, %54 : vector<16x32xf32>
    %56 = arith.addf %0, %55 : vector<16x32xf32>
    %cst_29 = arith.constant dense<0.000000e+00> : vector<16xf32>
    %57 = vector.multi_reduction <add>, %56, %cst_29 [1] : vector<16x32xf32> to vector<16xf32>
    %58 = vector.shape_cast %57 : vector<16xf32> to vector<16x1xf32>
    %cst_30 = arith.constant 3.200000e+01 : f32
    %59 = vector.broadcast %cst_30 : f32 to vector<16x1xf32>
    %60 = arith.divf %58, %59 : vector<16x1xf32>
    %61 = vector.broadcast %60 : vector<16x1xf32> to vector<16x32xf32>
    %62 = arith.subf %56, %61 : vector<16x32xf32>
    %63 = arith.mulf %62, %62 : vector<16x32xf32>
    %cst_31 = arith.constant dense<0.000000e+00> : vector<16xf32>
    %64 = vector.multi_reduction <add>, %63, %cst_31 [1] : vector<16x32xf32> to vector<16xf32>
    %65 = vector.shape_cast %64 : vector<16xf32> to vector<16x1xf32>
    %cst_32 = arith.constant 3.200000e+01 : f32
    %66 = vector.broadcast %cst_32 : f32 to vector<16x1xf32>
    %67 = arith.divf %65, %66 : vector<16x1xf32>
    %68 = vector.broadcast %60 : vector<16x1xf32> to vector<16x32xf32>
    %69 = arith.subf %56, %68 : vector<16x32xf32>
    %cst_33 = arith.constant 9.99999974E-6 : f32
    %70 = vector.broadcast %cst_33 : f32 to vector<16x1xf32>
    %71 = arith.addf %67, %70 : vector<16x1xf32>
    %72 = math.rsqrt %71 : vector<16x1xf32>
    %73 = vector.broadcast %72 : vector<16x1xf32> to vector<16x32xf32>
    %74 = arith.mulf %69, %73 : vector<16x32xf32>
    %75 = vector.broadcast %14 : vector<1x32xf32> to vector<16x32xf32>
    %76 = arith.mulf %74, %75 : vector<16x32xf32>
    %77 = vector.broadcast %15 : vector<1x32xf32> to vector<16x32xf32>
    %78 = arith.addf %76, %77 : vector<16x32xf32>
    %cst_34 = arith.constant dense<0.000000e+00> : vector<16x64xf32>
    %79 = tpu.matmul %78, %5, %cst_34 {dimension_numbers = #tpu.dot_dimension_numbers<[1], [0], [0], [1], [0, 0, 1, 1], [], []>} : vector<16x32xf32>, vector<32x64xf32>, vector<16x64xf32> -> vector<16x64xf32>
    %80 = vector.broadcast %16 : vector<1x64xf32> to vector<16x64xf32>
    %81 = arith.addf %79, %80 : vector<16x64xf32>
    %cst_35 = arith.constant 0.000000e+00 : f32
    %82 = vector.broadcast %cst_35 : f32 to vector<16x64xf32>
    %83 = arith.maximumf %81, %82 : vector<16x64xf32>
    %cst_36 = arith.constant dense<0.000000e+00> : vector<16x32xf32>
    %84 = tpu.matmul %83, %6, %cst_36 {dimension_numbers = #tpu.dot_dimension_numbers<[1], [0], [0], [1], [0, 0, 1, 1], [], []>} : vector<16x64xf32>, vector<64x32xf32>, vector<16x32xf32> -> vector<16x32xf32>
    %85 = vector.broadcast %17 : vector<1x32xf32> to vector<16x32xf32>
    %86 = arith.addf %84, %85 : vector<16x32xf32>
    %87 = arith.addf %78, %86 : vector<16x32xf32>
    %cst_37 = arith.constant dense<0.000000e+00> : vector<16xf32>
    %88 = vector.multi_reduction <add>, %87, %cst_37 [1] : vector<16x32xf32> to vector<16xf32>
    %89 = vector.shape_cast %88 : vector<16xf32> to vector<16x1xf32>
    %cst_38 = arith.constant 3.200000e+01 : f32
    %90 = vector.broadcast %cst_38 : f32 to vector<16x1xf32>
    %91 = arith.divf %89, %90 : vector<16x1xf32>
    %92 = vector.broadcast %91 : vector<16x1xf32> to vector<16x32xf32>
    %93 = arith.subf %87, %92 : vector<16x32xf32>
    %94 = arith.mulf %93, %93 : vector<16x32xf32>
    %cst_39 = arith.constant dense<0.000000e+00> : vector<16xf32>
    %95 = vector.multi_reduction <add>, %94, %cst_39 [1] : vector<16x32xf32> to vector<16xf32>
    %96 = vector.shape_cast %95 : vector<16xf32> to vector<16x1xf32>
    %cst_40 = arith.constant 3.200000e+01 : f32
    %97 = vector.broadcast %cst_40 : f32 to vector<16x1xf32>
    %98 = arith.divf %96, %97 : vector<16x1xf32>
    %99 = vector.broadcast %91 : vector<16x1xf32> to vector<16x32xf32>
    %100 = arith.subf %87, %99 : vector<16x32xf32>
    %cst_41 = arith.constant 9.99999974E-6 : f32
    %101 = vector.broadcast %cst_41 : f32 to vector<16x1xf32>
    %102 = arith.addf %98, %101 : vector<16x1xf32>
    %103 = math.rsqrt %102 : vector<16x1xf32>
    %104 = vector.broadcast %103 : vector<16x1xf32> to vector<16x32xf32>
    %105 = arith.mulf %100, %104 : vector<16x32xf32>
    %106 = vector.broadcast %18 : vector<1x32xf32> to vector<16x32xf32>
    %107 = arith.mulf %105, %106 : vector<16x32xf32>
    %108 = vector.broadcast %19 : vector<1x32xf32> to vector<16x32xf32>
    %109 = arith.addf %107, %108 : vector<16x32xf32>
    %cst_42 = arith.constant dense<0.000000e+00> : vector<16x16xf32>
    %110 = tpu.matmul %109, %7, %cst_42 {dimension_numbers = #tpu.dot_dimension_numbers<[1], [0], [0], [1], [0, 0, 1, 1], [], []>} : vector<16x32xf32>, vector<32x16xf32>, vector<16x16xf32> -> vector<16x16xf32>
    %111 = vector.broadcast %20 : vector<1x16xf32> to vector<16x16xf32>
    %112 = arith.addf %110, %111 : vector<16x16xf32>
    %113 = arith.negf %112 : vector<16x16xf32>
    %114 = math.exp %113 : vector<16x16xf32>
    %cst_43 = arith.constant 1.000000e+00 : f32
    %115 = vector.broadcast %cst_43 : f32 to vector<16x16xf32>
    %116 = arith.addf %115, %114 : vector<16x16xf32>
    %117 = arith.divf %115, %116 : vector<16x16xf32>
    %c0_44 = arith.constant 0 : index
    %c0_45 = arith.constant 0 : index
    %118 = vector.load %arg2[%c0_44, %c0_45] : memref<16x16xf32, #tpu.memory_space<vmem>>, vector<16x16xf32>
    tpu.vector_store %arg2[%c0_44, %c0_45], %117 {strides = array<i32>} : memref<16x16xf32, #tpu.memory_space<vmem>>, vector<16x16xf32>,
    return
  }
}

</mosaic_0001>

<bundles_post_ra>
// kernel: model_forward.1
= control target key start
LH: loop header
LB: loop body
LE: loop exit
PB: predicated region body
PF: predicated region fallthrough
CT: control target
= control target key end

     0   :  { %7 = vsyncpa [#allocation3], 0  ;;  %s1663_s0 = inlined_call_operand.hbm [shape: f32[16,32], index: 0, kind: input, shape index: {}]   ;;  %s1664_s1 = inlined_call_operand.hbm [shape: f32[472,128], index: 1, kind: input, shape index: {}]   ;;  %s1665_s2 = inlined_call_operand.hbm [shape: f32[16,16], index: 2, kind: output, shape index: {}]  }
   0x1   :  { %8 = vsyncpa [#allocation6], 0 }
   0x2   :  { %9 = vsyncpa [#allocation4], 0  ;;  %s1523_s9 = smov [#allocation2]  }
   0x3   :  { %s15_s10 = sshll.u32 %s1523_s9, 4  ;;  %s16_s10 = int_to_ptr.vmem [resolvable:$true] %s15_s10 }
   0x4   :  { %s1465_s11 = scalar_lea.vmem %s16_s10, 256  ;;  %p1470_p1 = scmp.lt.s32.totalorder %s16_s10, %s16_s10 }
   0x5   :  { %p1466_p0 = scmp.ne.s32.totalorder %s16_s10, %s1465_s11  ;;  %p1471_p2 = scmp.lt.s32.totalorder %s1465_s11, %s1465_s11 }
   0x7   :  { %p1472_p3 = por %p1471_p2, %p1470_p1 }
   0x9   :  { %p1473_p4 = pnand %p1472_p3, %p1466_p0 }
   0xb   :  { %1476 = shalt.err (!%p1473_p4)
}
   0xc   :  { %s1524_s12 = smov 128   ;;  %s1525_s13 = smov 8  }
   0xd   :  { %21 = dma.hbm_to_vmem [thread:$0]  %s1663_s0, 256, %s16_s10, [#allocation3], %s1524_s12, %s1524_s12, %s1525_s13  }
   0xe   :  { %s1526_s16 = smov [#allocation5]  }
   0xf   :  { %s27_s17 = sshll.u32 %s1526_s16, 4  ;;  %s28_s17 = int_to_ptr.vmem [resolvable:$true] %s27_s17 }
  0x10   :  { %s1485_s18 = scalar_lea.vmem %s28_s17, 7552  ;;  %p1490_p6 = scmp.lt.s32.totalorder %s28_s17, %s28_s17 }
  0x11   :  { %p1486_p5 = scmp.ne.s32.totalorder %s28_s17, %s1485_s18  ;;  %p1491_p7 = scmp.lt.s32.totalorder %s1485_s18, %s1485_s18 }
  0x13   :  { %p1492_p8 = por %p1491_p7, %p1490_p6 }
  0x15   :  { %p1493_p9 = pnand %p1492_p8, %p1486_p5 }
  0x17   :  { %1496 = shalt.err (!%p1493_p9)
}
  0x18   :  { %33 = dma.hbm_to_vmem [thread:$0]  %s1664_s1, 7552, %s28_s17, [#allocation6], %s1524_s12, %s1524_s12, %s1525_s13  }
  0x19   :  { %1517 = dma.done.wait [#allocation3], 256  }
  0x1a   :  { %1518 = vsyncadd [#allocation3], 4294967040 }
  0x1b   :  { %1519 = dma.done.wait [#allocation6], 7552  }
  0x1c   :  { %1520 = vsyncadd [#allocation6], 4294959744  ;;  %v49_v0 = vld [vmem:[#allocation5 + $0x38] sm:$0xff]  ;;  %v48_v2 = vld [vmem:[#allocation5 + $0x30] sm:$0xff]  ;;  %vm105_vm0 = vcmask 261120   ;;  %vm488_vm1 = vcmask 130048  }
  0x1d   :  { %v45_v1 = vld [vmem:[#allocation5 + $0x18] sm:$0xff]  ;;  %1298 = vmatprep.subr.mxu1 %v49_v0  ;;  %v44_v3 = vld [vmem:[#allocation5 + $0x10] sm:$0xff]  ;;  %v47_v4 = vld [vmem:[#allocation5 + $0x28] sm:$0xff]  ;;  %vm937_vm2 = vcmask 523264   ;;  %s1527_s0 = smov [#allocation7]  }
  0x1e   :  { %1287 = vmatprep.subr.mxu0 %v45_v1  ;;  %1299 = vmatpush3.msra.mxu1 %v49_v0  ;;  %v43_v5 = vld [vmem:[#allocation5 + $0x8] sm:$0xff]  ;;  %v46_v6 = vld [vmem:[#allocation5 + $0x20] sm:$0xff]  ;;  %v1555_v8 = vld [vmem:[#allocation2] sm:$0xff]  ;;  %s1163_s1 = sshll.u32 %s1527_s0, 4  ;;  %s1164_s1 = int_to_ptr.vmem [resolvable:$true] %s1163_s1 }
  0x1f   :  { %1288 = vmatpush3.msra.mxu0 %v45_v1  ;;  %1300 = vmatprep.subr.mxu1 %v48_v2  ;;  %v42_v7 = vld [vmem:[#allocation5] sm:$0xff]  ;;  %v1557_v9 = vld [vmem:[#allocation2 + $0x8] sm:$0xff]  ;;  %v1179_v10 = vld [vmem:[#allocation5 + $0x188] ss:$0 sm:$0xff]  ;;  %s1497_s21 = scalar_lea.vmem %s1164_s1, 256  ;;  %p1502_p11 = scmp.lt.s32.totalorder %s1164_s1, %s1164_s1 }
  0x20   :  { %1289 = vmatprep.subr.mxu0 %v44_v3  ;;  %1301 = vmatpush3.msra.mxu1 %v48_v2  ;;  %v1176_v13 = vld [vmem:[#allocation5 + $0x180] ss:$0 sm:$0xff]  ;;  %v1575_v22 = vld [vmem:[#allocation5 + $0x108] sm:$0xff]  ;;  %v1578_v23 = vld [vmem:[#allocation5 + $0x110] sm:$0xff]  ;;  %p1498_p10 = scmp.ne.s32.totalorder %s1164_s1, %s1497_s21  ;;  %p1503_p12 = scmp.lt.s32.totalorder %s1497_s21, %s1497_s21 }
  0x21   :  { %1290 = vmatpush3.msra.mxu0 %v44_v3  ;;  %1302 = vmatprep.subr.mxu1 %v47_v4  ;;  %v1569_v17 = vld [vmem:[#allocation5 + $0x100] sm:$0xff]  ;;  %v1583_v26 = vld [vmem:[#allocation5 + $0x118] sm:$0xff]  ;;  %v1591_v30 = vld [vmem:[#allocation5 + $0x128] sm:$0xff] }
  0x22   :  { %1291 = vmatprep.subr.mxu0 %v43_v5  ;;  %1303 = vmatpush3.msra.mxu1 %v47_v4  ;;  %v1586_v27 = vld [vmem:[#allocation5 + $0x120] sm:$0xff]  ;;  %v1594_v31 = vld [vmem:[#allocation5 + $0x130] sm:$0xff]  ;;  %v1599_v34 = vld [vmem:[#allocation5 + $0x138] sm:$0xff]  ;;  %p1504_p13 = por %p1503_p12, %p1502_p11 }
  0x23   :  { %1292 = vmatpush3.msra.mxu0 %v43_v5  ;;  %1304 = vmatprep.subr.mxu1 %v46_v6  ;;  %v53_v36 = vld [vmem:[#allocation5 + $0x58] sm:$0xff]  ;;  %v52_v37 = vld [vmem:[#allocation5 + $0x50] sm:$0xff]  ;;  %v51_v38 = vld [vmem:[#allocation5 + $0x48] sm:$0xff] }
  0x24   :  { %1293 = vmatprep.subr.mxu0 %v42_v7  ;;  %1305 = vmatpush3.msra.mxu1 %v46_v6  ;;  %v50_v39 = vld [vmem:[#allocation5 + $0x40] sm:$0xff]  ;;  %v83_v42 = vld [vmem:[#allocation5 + $0x148] sm:$0xff]  ;;  %v84_v46 = vld [vmem:[#allocation5 + $0x150] sm:$0xff]  ;;  %p1505_p0 = pnand %p1504_p13, %p1498_p10 }
  0x25   :  { %1306 = vmatprep.mubr.msk.f32.mxu1 %vm105_vm0, %v1555_v8  ;;  %1294 = vmatpush3.msra.mxu0 %v42_v7  ;;  %v82_v41 = vld [vmem:[#allocation5 + $0x140] sm:$0xff]  ;;  %v85_v49 = vld [vmem:[#allocation5 + $0x158] sm:$0xff]  ;;  %v87_v57 = vld [vmem:[#allocation5 + $0x168] sm:$0xff] }
  0x26   :  { %1295 = vmatprep.mubr.msk.f32.mxu0 %vm105_vm0, %v1555_v8  ;;  %1307 = vmatmul.mubr.msk.f32.vlgmr.msra.gmra.mxu1 %vm105_vm0, %v1557_v9  ;;  %v86_v53 = vld [vmem:[#allocation5 + $0x160] sm:$0xff]  ;;  %v88_v61 = vld [vmem:[#allocation5 + $0x170] sm:$0xff]  ;;  %v89_v1 = vld [vmem:[#allocation5 + $0x178] sm:$0xff] }
  0x27   :  { %1296 = vmatmul.mubr.msk.f32.vlgmr.msra.gmra.mxu0 %vm105_vm0, %v1557_v9  ;;  %1309 = vmatprep.subr.mxu0 %v53_v36 }
  0x28   :  { %1317 = vmatprep.mubr.msk.f32.mxu0 %vm105_vm0, %v1555_v8  ;;  %1310 = vmatpush3.msra.mxu0 %v53_v36 }
  0x29   :  { %1311 = vmatprep.subr.mxu0 %v52_v37 }
  0x2a   :  { %1312 = vmatpush3.msra.mxu0 %v52_v37 }
  0x2b   :  { %1313 = vmatprep.subr.mxu0 %v51_v38 }
  0x2c   :  { %1314 = vmatpush3.msra.mxu0 %v51_v38 }
  0x2d   :  { %1315 = vmatprep.subr.mxu0 %v50_v39 }
  0x2e   :  { %1316 = vmatpush3.msra.mxu0 %v50_v39 }
  0x2f   :  { %1318 = vmatmul.mubr.msk.f32.vlgmr.msra.gmra.mxu0 %vm105_vm0, %v1557_v9 }
  0xe6   :  { %v1308_v11 = vpop.f32.mrf.mxu1 }
  0xe7   :  { %v1297_v12 = vpop.f32.mrf.mxu0  ;;  %v263_v14 = vadd.f32 %v1308_v11, %v1179_v10 }
  0xe8   :  { %v257_v15 = vpop.f32.mrf.mxu1  ;;  %v184_v20 = vadd.f32 %v1297_v12, %v1176_v13 }
  0xe9   :  { %v178_v16 = vpop.f32.mrf.mxu0  ;;  %v258_v18 = vadd.f32 %v1179_v10, %v257_v15  ;;  %1320 = vmatprep.subr.msk.mxu1 %vm105_vm0, %v263_v14 }
  0xea   :  { %v179_v19 = vadd.f32 %v1176_v13, %v178_v16  ;;  %1321 = vmatpush3.xpose.msk.msra.mxu1 %vm105_vm0, %v263_v14  ;;  %v346_v24 = vmul.f32 %v184_v20, %v1575_v22  ;;  %v348_v28 = vmul.f32 %v184_v20, %v1583_v26  ;;  %v350_v32 = vmul.f32 %v184_v20, %v1591_v30 }
  0xeb   :  { %1322 = vmatprep.subr.msk.mxu1 %vm105_vm0, %v258_v18  ;;  %v352_v35 = vmul.f32 %v184_v20, %v1599_v34 }
  0xec   :  { %v345_v21 = vmul.f32 %v179_v19, %v1569_v17  ;;  %v347_v25 = vmul.f32 %v179_v19, %v1578_v23  ;;  %v349_v29 = vmul.f32 %v179_v19, %v1586_v27  ;;  %v351_v33 = vmul.f32 %v179_v19, %v1594_v31 }
  0xee   :  { %1324 = vmatprep.mubr.msk.f32.mxu1 %vm105_vm0, %v345_v21  ;;  %1323 = vmatpush3.xpose.msk.msra.mxu1 %vm105_vm0, %v258_v18 }
  0xf1   :  { %1325 = vmatmul.mubr.msk.f32.vlgmr.msra.gmra.mxu1 %vm105_vm0, %v346_v24 }
  0xf2   :  { %1327 = vmatprep.mubr.msk.f32.mxu1 %vm105_vm0, %v347_v25 }
  0xf5   :  { %1328 = vmatmul.mubr.msk.f32.gmra.mxu1 %vm105_vm0, %v348_v28 }
  0xf6   :  { %1330 = vmatprep.mubr.msk.f32.mxu1 %vm105_vm0, %v349_v29 }
  0xf9   :  { %1331 = vmatmul.mubr.msk.f32.gmra.mxu1 %vm105_vm0, %v350_v32 }
  0xfa   :  { %1333 = vmatprep.mubr.msk.f32.mxu1 %vm105_vm0, %v351_v33 }
  0xfd   :  { %1334 = vmatmul.mubr.msk.f32.gmra.mxu1 %vm105_vm0, %v352_v35 }
 0x1b1   :  { %v1326_v40 = vpop.f32.mrf.mxu1 }
 0x1b2   :  { %v455_v47 = vadd.f32 %v1326_v40, %v83_v42 }
 0x1b3   :  { %v449_v43 = vpop.f32.mrf.mxu1 }
 0x1b4   :  { %v450_v44 = vadd.f32 %v449_v43, %v82_v41  ;;  %v492_v56 = vsel %vm488_vm1, %v455_v47, -inf }
 0x1b5   :  { %v1329_v45 = vpop.f32.mrf.mxu1 }
 0x1b6   :  { %v489_v48 = vsel %vm488_vm1, %v450_v44, -inf  ;;  %v465_v54 = vadd.f32 %v1329_v45, %v85_v49 }
 0x1b7   :  { %v459_v50 = vpop.f32.mrf.mxu1  ;;  %490 = vmax.xlane.f32.xlu0 %v489_v48 }
 0x1b8   :  { %v460_v51 = vadd.f32 %v459_v50, %v84_v46  ;;  %v498_v63 = vsel %vm488_vm1, %v465_v54, -inf }
 0x1b9   :  { %v1332_v52 = vpop.f32.mrf.mxu1 }
 0x1ba   :  { %v495_v55 = vsel %vm488_vm1, %v460_v51, -inf  ;;  %v475_v62 = vadd.f32 %v1332_v52, %v87_v57 }
 0x1bb   :  { %v469_v58 = vpop.f32.mrf.mxu1  ;;  %496 = vmax.xlane.f32.xlu1 %v495_v55  ;;  %493 = vmax.xlane.f32.xlu0 %v492_v56 }
 0x1bc   :  { %v470_v59 = vadd.f32 %v469_v58, %v86_v53  ;;  %v504_v5 = vsel %vm488_vm1, %v475_v62, -inf  ;;  %v1319_v58 = vpop.f32.mrf.mxu0 }
 0x1bd   :  { %v1335_v60 = vpop.f32.mrf.mxu1 }
 0x1be   :  { %v501_v0 = vsel %vm488_vm1, %v470_v59, -inf  ;;  %v485_v4 = vadd.f32 %v1335_v60, %v89_v1 }
 0x1bf   :  { %v479_v2 = vpop.f32.mrf.mxu1  ;;  %499 = vmax.xlane.f32.xlu1 %v498_v63  ;;  %502 = vmax.xlane.f32.xlu0 %v501_v0 }
 0x1c0   :  { %v480_v3 = vadd.f32 %v479_v2, %v88_v61  ;;  %v510_v7 = vsel %vm488_vm1, %v485_v4, -inf  ;;  %v336_v61 = vpop.f32.mrf.mxu0 }
 0x1c2   :  { %v507_v6 = vsel %vm488_vm1, %v480_v3, -inf }
 0x1c3   :  { %505 = vmax.xlane.f32.xlu1 %v504_v5  ;;  %508 = vmax.xlane.f32.xlu0 %v507_v6 }
 0x1c7   :  { %511 = vmax.xlane.f32.xlu1 %v510_v7 }
 0x240   :  { %v491_v10 = vpop.xlane.xlu0 %490 }
 0x241   :  { %v513_v11 = vsub.f32 %v450_v44, %v491_v10 }
 0x243   :  { %v521_v12 = vmul.f32 1.442695, %v513_v11 }
 0x244   :  { %v497_v13 = vpop.xlane.xlu1 %496  ;;  %v494_v14 = vpop.xlane.xlu0 %493 }
 0x245   :  { %1409 = vpow2.f32 %v521_v12  ;;  %v515_v15 = vsub.f32 %v460_v51, %v497_v13  ;;  %v514_v16 = vsub.f32 %v455_v47, %v494_v14 }
 0x247   :  { %v525_v18 = vmul.f32 1.442695, %v515_v15  ;;  %v523_v19 = vmul.f32 1.442695, %v514_v16 }
 0x248   :  { %v500_v20 = vpop.xlane.xlu1 %499  ;;  %v503_v21 = vpop.xlane.xlu0 %502 }
 0x249   :  { %1411 = vpow2.f32 %v525_v18  ;;  %v516_v24 = vsub.f32 %v465_v54, %v500_v20  ;;  %v517_v25 = vsub.f32 %v470_v59, %v503_v21  ;;  %v1182_v59 = vld [vmem:[#allocation5 + $0x190] ss:$0 sm:$0xff] }
 0x24a   :  { %1413 = vpow2.f32 %v523_v19  ;;  %v342_v60 = vadd.f32 %v1319_v58, %v1182_v59 }
 0x24b   :  { %v527_v28 = vmul.f32 1.442695, %v516_v24  ;;  %v529_v29 = vmul.f32 1.442695, %v517_v25 }
 0x24c   :  { %v506_v32 = vpop.xlane.xlu1 %505  ;;  %v509_v33 = vpop.xlane.xlu0 %508  ;;  %1336 = vmatprep.subr.mxu0 %v342_v60 }
 0x24d   :  { %1415 = vpow2.f32 %v527_v28  ;;  %v518_v35 = vsub.f32 %v475_v62, %v506_v32  ;;  %v519_v36 = vsub.f32 %v480_v3, %v509_v33  ;;  %v337_v62 = vadd.f32 %v1182_v59, %v336_v61  ;;  %1337 = vmatpush3.msra.mxu0 %v342_v60  ;;  %v57_v32 = vld [vmem:[#allocation5 + $0x78] sm:$0xff]  ;;  %v56_v33 = vld [vmem:[#allocation5 + $0x70] sm:$0xff] }
 0x24e   :  { %1417 = vpow2.f32 %v529_v29  ;;  %1352 = vmatprep.subr.mxu1 %v57_v32 }
 0x24f   :  { %v531_v37 = vmul.f32 1.442695, %v518_v35  ;;  %v533_v38 = vmul.f32 1.442695, %v519_v36  ;;  %1338 = vmatprep.subr.mxu0 %v337_v62  ;;  %1353 = vmatpush3.msra.mxu1 %v57_v32  ;;  %v55_v35 = vld [vmem:[#allocation5 + $0x68] sm:$0xff]  ;;  %v54_v36 = vld [vmem:[#allocation5 + $0x60] sm:$0xff] }
 0x250   :  { %v512_v39 = vpop.xlane.xlu1 %511  ;;  %1339 = vmatpush3.msra.mxu0 %v337_v62  ;;  %1354 = vmatprep.subr.mxu1 %v56_v33 }
 0x251   :  { %1419 = vpow2.f32 %v531_v37  ;;  %v520_v40 = vsub.f32 %v485_v4, %v512_v39  ;;  %1355 = vmatpush3.msra.mxu1 %v56_v33  ;;  %v1207_v33 = vld [vmem:[#allocation5 + $0x1a8] ss:$0 sm:$0xff] }
 0x252   :  { %v1410_v41 = vpop.eup %1409  ;;  %1421 = vpow2.f32 %v533_v38  ;;  %1356 = vmatprep.subr.mxu1 %v55_v35 }
 0x253   :  { %v535_v42 = vmul.f32 1.442695, %v520_v40  ;;  %v537_v43 = vsel %vm488_vm1, %v1410_v41, 0.0  ;;  %1357 = vmatpush3.msra.mxu1 %v55_v35 }
 0x254   :  { %538 = vadd.xlane.f32.xlu0 %v537_v43  ;;  %1358 = vmatprep.subr.mxu1 %v54_v36 }
 0x255   :  { %1423 = vpow2.f32 %v535_v42  ;;  %1359 = vmatpush3.msra.mxu1 %v54_v36 }
 0x256   :  { %v1412_v44 = vpop.eup %1411 }
 0x257   :  { %v1414_v45 = vpop.eup %1413  ;;  %v543_v46 = vsel %vm488_vm1, %v1412_v44, 0.0 }
 0x258   :  { %544 = vadd.xlane.f32.xlu0 %v543_v46  ;;  %v540_v47 = vsel %vm488_vm1, %v1414_v45, 0.0 }
 0x259   :  { %541 = vadd.xlane.f32.xlu1 %v540_v47 }
 0x25a   :  { %v1416_v48 = vpop.eup %1415 }
 0x25b   :  { %v1418_v49 = vpop.eup %1417  ;;  %v546_v50 = vsel %vm488_vm1, %v1416_v48, 0.0 }
 0x25c   :  { %v549_v51 = vsel %vm488_vm1, %v1418_v49, 0.0 }
 0x25d   :  { %547 = vadd.xlane.f32.xlu1 %v546_v50  ;;  %550 = vadd.xlane.f32.xlu0 %v549_v51 }
 0x25e   :  { %v1420_v52 = vpop.eup %1419 }
 0x25f   :  { %v1422_v53 = vpop.eup %1421  ;;  %v552_v54 = vsel %vm488_vm1, %v1420_v52, 0.0 }
 0x260   :  { %v555_v55 = vsel %vm488_vm1, %v1422_v53, 0.0 }
 0x261   :  { %553 = vadd.xlane.f32.xlu1 %v552_v54  ;;  %556 = vadd.xlane.f32.xlu0 %v555_v55 }
 0x262   :  { %v1424_v56 = vpop.eup %1423 }
 0x263   :  { %v558_v57 = vsel %vm488_vm1, %v1424_v56, 0.0 }
 0x265   :  { %559 = vadd.xlane.f32.xlu1 %v558_v57 }
 0x2dd   :  { %v539_v63 = vpop.xlane.xlu0 %538 }
 0x2de   :  { %1425 = vrcp.f32 %v539_v63 }
 0x2e1   :  { %v545_v0 = vpop.xlane.xlu0 %544 }
 0x2e2   :  { %v542_v1 = vpop.xlane.xlu1 %541  ;;  %1427 = vrcp.f32 %v545_v0 }
 0x2e3   :  { %1429 = vrcp.f32 %v542_v1 }
 0x2e6   :  { %v548_v2 = vpop.xlane.xlu1 %547  ;;  %v551_v3 = vpop.xlane.xlu0 %550 }
 0x2e7   :  { %1431 = vrcp.f32 %v548_v2 }
 0x2e8   :  { %1433 = vrcp.f32 %v551_v3 }
 0x2ea   :  { %v554_v4 = vpop.xlane.xlu1 %553  ;;  %v557_v5 = vpop.xlane.xlu0 %556 }
 0x2eb   :  { %v1426_v6 = vpop.eup %1425  ;;  %1435 = vrcp.f32 %v554_v4 }
 0x2ec   :  { %1437 = vrcp.f32 %v557_v5  ;;  %v569_v7 = vmul.f32 %v1426_v6, %v1410_v41  ;;  %v61_v5 = vld [vmem:[#allocation5 + $0x98] sm:$0xff]  ;;  %v59_v6 = vld [vmem:[#allocation5 + $0x88] sm:$0xff] }
 0x2ed   :  { %1363 = vmatprep.subr.mxu0 %v61_v5 }
 0x2ee   :  { %v560_v10 = vpop.xlane.xlu1 %559  ;;  %1340 = vmatprep.mubr.msk.f32.mxu0 %vm488_vm1, %v569_v7  ;;  %v58_v7 = vld [vmem:[#allocation5 + $0x80] sm:$0xff] }
 0x2ef   :  { %v1428_v11 = vpop.eup %1427  ;;  %1439 = vrcp.f32 %v560_v10  ;;  %v69_v10 = vld [vmem:[#allocation5 + $0xd8] sm:$0xff] }
 0x2f0   :  { %v1430_v12 = vpop.eup %1429  ;;  %v571_v13 = vmul.f32 %v1428_v11, %v1412_v44  ;;  %v68_v11 = vld [vmem:[#allocation5 + $0xd0] sm:$0xff]  ;;  %1374 = vmatprep.subr.mxu1 %v69_v10 }
 0x2f1   :  { %v570_v14 = vmul.f32 %v1430_v12, %v1414_v45  ;;  %v67_v12 = vld [vmem:[#allocation5 + $0xc8] sm:$0xff] }
 0x2f3   :  { %1341 = vmatmul.mubr.msk.f32.vlgmr.msra.gmra.mxu0 %vm488_vm1, %v570_v14 }
 0x2f4   :  { %v1432_v15 = vpop.eup %1431  ;;  %1343 = vmatprep.mubr.msk.f32.mxu0 %vm488_vm1, %v571_v13  ;;  %1364 = vmatpush3.msra.mxu0 %v61_v5  ;;  %v66_v13 = vld [vmem:[#allocation5 + $0xc0] sm:$0xff] }
 0x2f5   :  { %v1434_v16 = vpop.eup %1433  ;;  %v572_v18 = vmul.f32 %v1432_v15, %v1416_v48 }
 0x2f6   :  { %v573_v19 = vmul.f32 %v1434_v16, %v1418_v49 }
 0x2f7   :  { %1344 = vmatmul.mubr.msk.f32.gmra.mxu0 %vm488_vm1, %v572_v18 }
 0x2f8   :  { %v1436_v20 = vpop.eup %1435  ;;  %1346 = vmatprep.mubr.msk.f32.mxu0 %vm488_vm1, %v573_v19 }
 0x2f9   :  { %v1438_v21 = vpop.eup %1437  ;;  %v574_v24 = vmul.f32 %v1436_v20, %v1420_v52 }
 0x2fa   :  { %v575_v25 = vmul.f32 %v1438_v21, %v1422_v53 }
 0x2fb   :  { %1347 = vmatmul.mubr.msk.f32.gmra.mxu0 %vm488_vm1, %v574_v24  ;;  %v1206_v24 = vld [vmem:[#allocation5 + $0x1a0] ss:$0 sm:$0xff] }
 0x2fc   :  { %v1440_v28 = vpop.eup %1439  ;;  %1349 = vmatprep.mubr.msk.f32.mxu0 %vm488_vm1, %v575_v25 }
 0x2fd   :  { %v576_v29 = vmul.f32 %v1440_v28, %v1424_v56 }
 0x2ff   :  { %1350 = vmatmul.mubr.msk.f32.gmra.mxu0 %vm488_vm1, %v576_v29 }
 0x3b3   :  { %v1342_v37 = vpop.f32.mrf.mxu0 }
 0x3b4   :  { %v707_v47 = vmul.f32 %v1342_v37, %v1575_v22 }
 0x3b5   :  { %v667_v38 = vpop.f32.mrf.mxu0 }
 0x3b6   :  { %v706_v45 = vmul.f32 %v667_v38, %v1569_v17  ;;  %v1203_v17 = vld [vmem:[#allocation5 + $0x198] ss:$0 sm:$0xff] }
 0x3b7   :  { %v1345_v39 = vpop.f32.mrf.mxu0  ;;  %v65_v38 = vld [vmem:[#allocation5 + $0xb8] sm:$0xff] }
 0x3b8   :  { %v709_v43 = vmul.f32 %v1345_v39, %v1583_v26  ;;  %v64_v39 = vld [vmem:[#allocation5 + $0xb0] sm:$0xff] }
 0x3b9   :  { %v677_v40 = vpop.f32.mrf.mxu0 }
 0x3ba   :  { %v708_v42 = vmul.f32 %v677_v40, %v1578_v23  ;;  %v715_v51 = vadd.f32 %v709_v43, %v707_v47  ;;  %v63_v40 = vld [vmem:[#allocation5 + $0xa8] sm:$0xff] }
 0x3bb   :  { %v1348_v41 = vpop.f32.mrf.mxu0 }
 0x3bc   :  { %v711_v48 = vmul.f32 %v1348_v41, %v1591_v30  ;;  %v714_v50 = vadd.f32 %v708_v42, %v706_v45  ;;  %v62_v41 = vld [vmem:[#allocation5 + $0xa0] sm:$0xff]  ;;  %v1208_v42 = vld [vmem:[#allocation5 + $0x1b0] ss:$0 sm:$0xff] }
 0x3bd   :  { %v687_v44 = vpop.f32.mrf.mxu0 }
 0x3be   :  { %v710_v46 = vmul.f32 %v687_v44, %v1586_v27  ;;  %v717_v55 = vadd.f32 %v715_v51, %v711_v48 }
 0x3bf   :  { %v1351_v49 = vpop.f32.mrf.mxu0 }
 0x3c0   :  { %v713_v52 = vmul.f32 %v1351_v49, %v1599_v34  ;;  %v716_v54 = vadd.f32 %v714_v50, %v710_v46  ;;  %v1211_v49 = vld [vmem:[#allocation5 + $0x1b8] ss:$0 sm:$0xff] }
 0x3c1   :  { %v697_v53 = vpop.f32.mrf.mxu0 }
 0x3c2   :  { %v712_v23 = vmul.f32 %v697_v53, %v1594_v31  ;;  %v719_v56 = vadd.f32 %v717_v55, %v713_v52 }
 0x3c4   :  { %v718_v26 = vadd.f32 %v716_v54, %v712_v23 }
 0x3c6   :  { %1360 = vmatprep.mubr.msk.f32.mxu1 %vm105_vm0, %v718_v26 }
 0x3c7   :  { %1361 = vmatmul.mubr.msk.f32.vlgmr.msra.gmra.mxu1 %vm105_vm0, %v719_v56 }
 0x3c8   :  { %1375 = vmatpush3.msra.mxu1 %v69_v10 }
 0x3c9   :  { %1376 = vmatprep.subr.mxu1 %v68_v11 }
 0x3ca   :  { %1377 = vmatpush3.msra.mxu1 %v68_v11 }
 0x3cb   :  { %1378 = vmatprep.subr.mxu1 %v67_v12 }
 0x3cc   :  { %1379 = vmatpush3.msra.mxu1 %v67_v12  ;;  %v1215_v12 = vld [vmem:[#allocation5 + $0x1c8] ss:$0 sm:$0xff] }
 0x3cd   :  { %1380 = vmatprep.subr.mxu1 %v66_v13 }
 0x3ce   :  { %1381 = vmatpush3.msra.mxu1 %v66_v13 }
 0x3cf   :  { %1382 = vmatprep.subr.mxu1 %v65_v38 }
 0x3d0   :  { %1383 = vmatpush3.msra.mxu1 %v65_v38 }
 0x3d1   :  { %1384 = vmatprep.subr.mxu1 %v64_v39 }
 0x3d2   :  { %1385 = vmatpush3.msra.mxu1 %v64_v39 }
 0x3d3   :  { %1386 = vmatprep.subr.mxu1 %v63_v40 }
 0x3d4   :  { %1387 = vmatpush3.msra.mxu1 %v63_v40 }
 0x3d5   :  { %1388 = vmatprep.subr.mxu1 %v62_v41 }
 0x3d6   :  { %1389 = vmatpush3.msra.mxu1 %v62_v41 }
 0x487   :  { %v1362_v22 = vpop.f32.mrf.mxu1 }
 0x488   :  { %v802_v27 = vadd.f32 %v1362_v22, %v1203_v17 }
 0x489   :  { %v796_v30 = vpop.f32.mrf.mxu1 }
 0x48a   :  { %v797_v57 = vadd.f32 %v1203_v17, %v796_v30  ;;  %v806_v58 = vadd.f32 %v802_v27, %v1557_v9 }
 0x48c   :  { %v810_v34 = vsel %vm105_vm0, %v806_v58, 0.0  ;;  %v805_v59 = vadd.f32 %v797_v57, %v1555_v8  ;;  %v60_v8 = vld [vmem:[#allocation5 + $0x90] sm:$0xff] }
 0x48d   :  { %811 = vadd.xlane.f32.xlu1 %v810_v34  ;;  %1365 = vmatprep.subr.mxu0 %v60_v8 }
 0x48e   :  { %v807_v31 = vsel %vm105_vm0, %v805_v59, 0.0  ;;  %1366 = vmatpush3.msra.mxu0 %v60_v8  ;;  %v1214_v8 = vld [vmem:[#allocation5 + $0x1c0] ss:$0 sm:$0xff] }
 0x48f   :  { %808 = vadd.xlane.f32.xlu0 %v807_v31  ;;  %1367 = vmatprep.subr.mxu0 %v59_v6 }
 0x490   :  { %1368 = vmatpush3.msra.mxu0 %v59_v6 }
 0x491   :  { %1369 = vmatprep.subr.mxu0 %v58_v7 }
 0x492   :  { %1370 = vmatpush3.msra.mxu0 %v58_v7 }
 0x516   :  { %v812_v60 = vpop.xlane.xlu1 %811 }
 0x517   :  { %v815_v61 = vmul.f32 0.03125, %v812_v60  ;;  %v73_v60 = vld [vmem:[#allocation5 + $0xf8] sm:$0xff] }
 0x518   :  { %v809_v62 = vpop.xlane.xlu0 %808  ;;  %1393 = vmatprep.subr.mxu0 %v73_v60 }
 0x519   :  { %v817_v63 = vsub.f32 %v806_v58, %v815_v61  ;;  %v814_v0 = vmul.f32 0.03125, %v809_v62  ;;  %v72_v61 = vld [vmem:[#allocation5 + $0xf0] sm:$0xff]  ;;  %v71_v62 = vld [vmem:[#allocation5 + $0xe8] sm:$0xff] }
 0x51b   :  { %v816_v1 = vsub.f32 %v805_v59, %v814_v0  ;;  %v819_v2 = vmul.f32 %v817_v63, %v817_v63 }
 0x51d   :  { %v823_v3 = vsel %vm105_vm0, %v819_v2, 0.0  ;;  %v818_v4 = vmul.f32 %v816_v1, %v816_v1 }
 0x51e   :  { %824 = vadd.xlane.f32.xlu1 %v823_v3 }
 0x51f   :  { %v820_v9 = vsel %vm105_vm0, %v818_v4, 0.0 }
 0x520   :  { %821 = vadd.xlane.f32.xlu0 %v820_v9 }
 0x5a7   :  { %v825_v14 = vpop.xlane.xlu1 %824 }
 0x5a8   :  { %v827_v15 = vmul.f32 0.03125, %v825_v14 }
 0x5a9   :  { %v822_v16 = vpop.xlane.xlu0 %821 }
 0x5aa   :  { %v829_v18 = vadd.f32 1e-05, %v827_v15  ;;  %v826_v19 = vmul.f32 0.03125, %v822_v16  ;;  %v1216_v16 = vld [vmem:[#allocation5 + $0x1d0] ss:$0 sm:$0xff] }
 0x5ac   :  { %1441 = vrsqrt.f32 %v829_v18  ;;  %v828_v20 = vadd.f32 1e-05, %v826_v19 }
 0x5ae   :  { %1443 = vrsqrt.f32 %v828_v20 }
 0x5b9   :  { %v1442_v21 = vpop.eup %1441 }
 0x5ba   :  { %v833_v25 = vmul.f32 %v1442_v21, %v817_v63  ;;  %v70_v63 = vld [vmem:[#allocation5 + $0xe0] sm:$0xff] }
 0x5bb   :  { %v1444_v28 = vpop.eup %1443 }
 0x5bc   :  { %v832_v29 = vmul.f32 %v1444_v28, %v816_v1  ;;  %v839_v32 = vmul.f32 %v1206_v24, %v833_v25 }
 0x5be   :  { %v838_v35 = vmul.f32 %v1206_v24, %v832_v29  ;;  %v845_v37 = vadd.f32 %v1207_v33, %v839_v32 }
 0x5c0   :  { %v844_v36 = vadd.f32 %v1207_v33, %v838_v35 }
 0x5c2   :  { %1371 = vmatprep.mubr.msk.f32.mxu0 %vm105_vm0, %v844_v36 }
 0x5c3   :  { %1372 = vmatmul.mubr.msk.f32.vlgmr.msra.gmra.mxu0 %vm105_vm0, %v845_v37 }
 0x5c4   :  { %1394 = vmatpush3.msra.mxu0 %v73_v60 }
 0x5c5   :  { %1395 = vmatprep.subr.mxu0 %v72_v61 }
 0x5c6   :  { %1396 = vmatpush3.msra.mxu0 %v72_v61 }
 0x5c7   :  { %1397 = vmatprep.subr.mxu0 %v71_v62 }
 0x5c8   :  { %1398 = vmatpush3.msra.mxu0 %v71_v62 }
 0x5c9   :  { %1399 = vmatprep.subr.mxu0 %v70_v63 }
 0x5ca   :  { %1400 = vmatpush3.msra.mxu0 %v70_v63 }
 0x683   :  { %v1373_v43 = vpop.f32.mrf.mxu0 }
 0x684   :  { %v928_v44 = vadd.f32 %v1373_v43, %v1208_v42 }
 0x685   :  { %v922_v45 = vpop.f32.mrf.mxu0 }
 0x686   :  { %v923_v46 = vadd.f32 %v1208_v42, %v922_v45  ;;  %v932_v48 = vmax.f32 %v928_v44, 0.0 }
 0x688   :  { %v931_v47 = vmax.f32 %v923_v46, 0.0 }
 0x68a   :  { %1390 = vmatprep.mubr.msk.f32.mxu1 %vm937_vm2, %v931_v47 }
 0x68b   :  { %1391 = vmatmul.mubr.msk.f32.vlgmr.msra.gmra.mxu1 %vm937_vm2, %v932_v48 }
 0x74b   :  { %v1392_v50 = vpop.f32.mrf.mxu1 }
 0x74c   :  { %v1016_v51 = vadd.f32 %v1392_v50, %v1211_v49 }
 0x74d   :  { %v1010_v52 = vpop.f32.mrf.mxu1 }
 0x74e   :  { %v1011_v53 = vadd.f32 %v1211_v49, %v1010_v52  ;;  %v1020_v54 = vadd.f32 %v1016_v51, %v845_v37 }
 0x750   :  { %v1024_v23 = vsel %vm105_vm0, %v1020_v54, 0.0  ;;  %v1019_v55 = vadd.f32 %v1011_v53, %v844_v36 }
 0x751   :  { %1025 = vadd.xlane.f32.xlu1 %v1024_v23 }
 0x752   :  { %v1021_v26 = vsel %vm105_vm0, %v1019_v55, 0.0 }
 0x753   :  { %1022 = vadd.xlane.f32.xlu0 %v1021_v26 }
 0x7da   :  { %v1026_v56 = vpop.xlane.xlu1 %1025 }
 0x7db   :  { %v1028_v17 = vmul.f32 0.03125, %v1026_v56 }
 0x7dc   :  { %v1023_v22 = vpop.xlane.xlu0 %1022 }
 0x7dd   :  { %v1030_v27 = vsub.f32 %v1020_v54, %v1028_v17  ;;  %v1027_v30 = vmul.f32 0.03125, %v1023_v22 }
 0x7df   :  { %v1029_v57 = vsub.f32 %v1019_v55, %v1027_v30  ;;  %v1032_v58 = vmul.f32 %v1030_v27, %v1030_v27 }
 0x7e1   :  { %v1036_v34 = vsel %vm105_vm0, %v1032_v58, 0.0  ;;  %v1031_v59 = vmul.f32 %v1029_v57, %v1029_v57 }
 0x7e2   :  { %1037 = vadd.xlane.f32.xlu1 %v1036_v34 }
 0x7e3   :  { %v1033_v31 = vsel %vm105_vm0, %v1031_v59, 0.0 }
 0x7e4   :  { %1034 = vadd.xlane.f32.xlu0 %v1033_v31 }
 0x86b   :  { %v1038_v0 = vpop.xlane.xlu1 %1037 }
 0x86c   :  { %v1040_v1 = vmul.f32 0.03125, %v1038_v0 }
 0x86d   :  { %v1035_v2 = vpop.xlane.xlu0 %1034 }
 0x86e   :  { %v1042_v3 = vadd.f32 1e-05, %v1040_v1  ;;  %v1039_v4 = vmul.f32 0.03125, %v1035_v2 }
 0x870   :  { %1445 = vrsqrt.f32 %v1042_v3  ;;  %v1041_v9 = vadd.f32 1e-05, %v1039_v4 }
 0x872   :  { %1447 = vrsqrt.f32 %v1041_v9 }
 0x87d   :  { %v1446_v5 = vpop.eup %1445 }
 0x87e   :  { %v1046_v6 = vmul.f32 %v1446_v5, %v1030_v27 }
 0x87f   :  { %v1448_v7 = vpop.eup %1447 }
 0x880   :  { %v1045_v10 = vmul.f32 %v1448_v7, %v1029_v57  ;;  %v1052_v11 = vmul.f32 %v1214_v8, %v1046_v6 }
 0x882   :  { %v1051_v13 = vmul.f32 %v1214_v8, %v1045_v10  ;;  %v1058_v15 = vadd.f32 %v1215_v12, %v1052_v11 }
 0x884   :  { %v1057_v14 = vadd.f32 %v1215_v12, %v1051_v13 }
 0x886   :  { %1401 = vmatprep.mubr.msk.f32.mxu0 %vm105_vm0, %v1057_v14 }
 0x887   :  { %1402 = vmatmul.mubr.msk.f32.vlgmr.msra.gmra.mxu0 %vm105_vm0, %v1058_v15 }
 0x947   :  { %v1403_v18 = vpop.f32.mrf.mxu0 }
 0x948   :  { %v1141_v19 = vadd.f32 %v1403_v18, %v1216_v16 }
 0x949   :  { %v1135_v20 = vpop.f32.mrf.mxu0 }
 0x94a   :  { %v1220_v21 = vmul.f32 -1.442695, %v1141_v19  ;;  %v1136_v24 = vadd.f32 %v1216_v16, %v1135_v20 }
 0x94c   :  { %1449 = vpow2.f32 %v1220_v21  ;;  %v1219_v25 = vmul.f32 -1.442695, %v1136_v24 }
 0x94e   :  { %1451 = vpow2.f32 %v1219_v25 }
 0x959   :  { %v1450_v28 = vpop.eup %1449 }
 0x95a   :  { %v1151_v29 = vadd.f32 1.0, %v1450_v28 }
 0x95b   :  { %v1452_v32 = vpop.eup %1451 }
 0x95c   :  { %1453 = vrcp.f32 %v1151_v29  ;;  %v1150_v33 = vadd.f32 1.0, %v1452_v32 }
 0x95e   :  { %1455 = vrcp.f32 %v1150_v33 }
 0x969   :  { %v1454_v35 = vpop.eup %1453 }
 0x96a   :  { %1157 = vst.msk [vmem:[#allocation7 + $0x8] sm:$0xff] %vm488_vm1, %v1454_v35 }
 0x96b   :  { %v1456_v36 = vpop.eup %1455 }
 0x96c   :  { %1156 = vst.msk [vmem:[#allocation7] sm:$0xff] %vm488_vm1, %v1456_v36 }
 0x96d   :  { %1508 = shalt.err (!%p1505_p0)
}
 0x96e   :  { %1169 = dma.vmem_to_hbm [thread:$0]  %s1164_s1, 256, %s1665_s2, [#allocation4], %s1524_s12, %s1524_s12, %s1525_s13  }
 0x96f   :  { %1521 = dma.done.wait [#allocation4], 256  }
 0x970   :  { %1522 = vsyncadd [#allocation4], 4294967040 }
 0x971   :  { %1173 = vsyncpa [#allocation3], 1 }
 0x972   :  { %1174 = vsyncpa [#allocation6], 1 }
 0x973   :  { %1175 = vsyncpa [#allocation4], 1 }

</bundles_post_ra>
